<compile_context>
chip_gen: v7x
topology: tpu7x:2x2x1
jax: 0.10.0
libtpu: 0.0.40
codegen_flags: <defaults>
</compile_context>

<pallas_src>
import functools

import jax
import jax.numpy as jnp
from jax.experimental import pallas as pl
from jax.experimental.pallas import tpu as pltpu


LANE = 128          # TPU lane width; feature dims and node dim are padded to this.
MAX_NP = 16384      # dense-path ceiling; TODO(synk): block-sparse SpMM past this.


# ---------------------------------------------------------------------------
# Fused, row-tiled Pallas kernel.
# grid = (3 layers ["arbitrary"], NP // TILE_M row tiles ["arbitrary"])
# Layer axis is outermost -> all row tiles of layer l finish before layer l+1
# starts (the scratch buffers h1/h2 carry the activations across grid steps).
# ---------------------------------------------------------------------------
def gcn_tiled_kernel(x_ref, adj_ref, w_ref, b_ref, pool_ref, out_ref,
                     h1_ref, h2_ref, xw_ref, *, tile_m):
    l = pl.program_id(0)   # layer index 0..2
    r = pl.program_id(1)   # adjacency row-tile index

    # ---- once per layer (first row tile): feature transform XW for ALL nodes ----
    @pl.when(r == 0)
    def _():
        @pl.when(l == 0)
        def _():
            xw_ref[...] = jnp.dot(
                x_ref[...], w_ref[...],
                preferred_element_type=jnp.float32).astype(jnp.bfloat16)

        @pl.when(l == 1)
        def _():
            xw_ref[...] = jnp.dot(
                h1_ref[...], w_ref[...],
                preferred_element_type=jnp.float32).astype(jnp.bfloat16)

        @pl.when(l == 2)
        def _():
            xw_ref[...] = jnp.dot(
                h2_ref[...], w_ref[...],
                preferred_element_type=jnp.float32).astype(jnp.bfloat16)

    # ---- per row tile: neighbourhood aggregation on the MXU ----
    # adj tile is read straight from its (double-buffered) VMEM block; it is not bound
    # to a value that stays live across layers.
    agg = jnp.dot(adj_ref[...], xw_ref[...],
                  preferred_element_type=jnp.float32)     # [tile_m, 128] f32
    agg = agg + b_ref[...]                                # bias broadcast [1, 128]

    row0 = pl.multiple_of(r * tile_m, tile_m)

    @pl.when(l == 0)
    def _():
        h1_ref[pl.ds(row0, tile_m), :] = jnp.maximum(agg, 0.0).astype(jnp.bfloat16)

    @pl.when(l == 1)
    def _():
        h2_ref[pl.ds(row0, tile_m), :] = jnp.maximum(agg, 0.0).astype(jnp.bfloat16)

    # ---- last layer: no ReLU, accumulate global mean pool  P @ h3 ----
    @pl.when(l == 2)
    def _():
        @pl.when(r == 0)
        def _():
            out_ref[...] = jnp.zeros_like(out_ref)
        out_ref[...] += jnp.dot(
            pool_ref[...].astype(jnp.bfloat16), agg.astype(jnp.bfloat16),
            preferred_element_type=jnp.float32)


# ---------------------------------------------------------------------------
# VMEM budgeting / tile selection
# ---------------------------------------------------------------------------
def _vmem_bytes_estimate(np_, tile_m, g_pad):
    bf16, f32 = 2, 4
    adj = 2 * tile_m * np_ * bf16        # adjacency row tile, double-buffered
    x = 2 * np_ * LANE * bf16            # node features (resident block)
    w = 2 * LANE * LANE * bf16
    b = 2 * 1 * LANE * f32
    pool = 2 * g_pad * tile_m * f32
    out = 2 * g_pad * LANE * f32
    scr = 3 * np_ * LANE * bf16          # h1, h2, xw scratch
    return adj + x + w + b + pool + out + scr


def _pick_tile_m(np_, g_pad, budget_bytes=32 * 1024 * 1024):
    # Biggest row tile (<= 1024) that divides NP and keeps the footprint under budget.
    for t in (1024, 512, 256, 128):
        if np_ % t == 0 and _vmem_bytes_estimate(np_, t, g_pad) <= budget_bytes:
            return t
    return 128  # NP is always a multiple of 128


# ---------------------------------------------------------------------------
# Plain-JAX glue: padding, graph preprocessing, parameters
# ---------------------------------------------------------------------------
def _round_up(n, m):
    return ((n + m - 1) // m) * m


def _pad2d(a, rows, cols):
    out = jnp.zeros((rows, cols), a.dtype)
    return out.at[: a.shape[0], : a.shape[1]].set(a)


def build_normalized_adjacency(edge_index, num_nodes):
    """A_hat = D^{-1/2} (A + I) D^{-1/2} (dense), edges made bidirectional."""
    src, dst = edge_index[0], edge_index[1]
    a = jnp.zeros((num_nodes, num_nodes), jnp.float32)
    a = a.at[dst, src].set(1.0)
    a = a.at[src, dst].set(1.0)                    # symmetrize
    a = a + jnp.eye(num_nodes, dtype=jnp.float32)  # self loops
    a = jnp.minimum(a, 1.0)
    deg = jnp.sum(a, axis=1)
    d_inv_sqrt = jnp.where(deg > 0, 1.0 / jnp.sqrt(deg), 0.0)
    return d_inv_sqrt[:, None] * a * d_inv_sqrt[None, :]


def build_pool_matrix(batch, num_graphs, num_nodes):
    """P[g, i] = 1/|{j : batch[j]==g}| if batch[i]==g else 0."""
    one_hot = (batch[None, :] == jnp.arange(num_graphs)[:, None]).astype(jnp.float32)
    counts = jnp.maximum(jnp.sum(one_hot, axis=1, keepdims=True), 1.0)
    return one_hot / counts


def init_gcn_params(key, num_node_features, hidden_dim, output_dim):
    dims = [(num_node_features, hidden_dim),
            (hidden_dim, hidden_dim),
            (hidden_dim, output_dim)]
    params = []
    for i, (fi, fo) in enumerate(dims):
        kw = jax.random.fold_in(key, i)
        scale = 1.0 / jnp.sqrt(jnp.float32(fi))
        w = jax.random.normal(kw, (fi, fo), jnp.float32) * scale
        b = jnp.zeros((fo,), jnp.float32)
        params.append((w, b))
    return params


def gcn_preprocess(x, edge_index, batch, num_graphs):
    """Build padded node features, A_hat and pooling matrix.

    O(N^2) scatter-style work — call ONCE per graph/batch and cache the results;
    at small N it dominates wall-clock, not the Pallas kernel.
    """
    n, f_in = x.shape
    assert f_in <= LANE, "feature dim > 128 not supported by this kernel"
    np_ = _round_up(n, LANE)
    g_pad = _round_up(max(num_graphs, 1), 8)   # unmasked (8,128) output tile

    adj = build_normalized_adjacency(edge_index, n)
    pool = build_pool_matrix(batch, num_graphs, n)

    # Zero padding is exact: padded adjacency rows/cols and pooling columns are zero,
    # so padded nodes/graphs never leak into valid outputs.
    x_p = _pad2d(x, np_, LANE).astype(jnp.bfloat16)
    adj_p = _pad2d(adj, np_, np_).astype(jnp.bfloat16)
    pool_p = _pad2d(pool, g_pad, np_)          # f32 (cast to bf16 inside the kernel)
    return x_p, adj_p, pool_p


def pad_gcn_params(params):
    """Stack + zero-pad weights/biases to [3, 128, 128] / [3, 1, 128] (cacheable)."""
    (w1, b1), (w2, b2), (w3, b3) = params
    assert max(w1.shape[1], w2.shape[1], w3.shape[1], w1.shape[0]) <= LANE
    w_p = jnp.stack([_pad2d(w, LANE, LANE) for w in (w1, w2, w3)]).astype(jnp.bfloat16)
    b_p = jnp.stack([_pad2d(b.reshape(1, -1), 1, LANE) for b in (b1, b2, b3)])  # f32
    return w_p, b_p


@jax.jit
def gcn_apply_padded(x_p, adj_p, pool_p, w_p, b_p):
    """Run the fused 3-layer GCN + mean pool on pre-padded operands. Returns [g_pad, 128]."""
    np_ = adj_p.shape[0]
    g_pad = pool_p.shape[0]
    assert np_ <= MAX_NP, "dense A_hat path: TODO(synk) block-sparse SpMM past 16k nodes"

    tile_m = _pick_tile_m(np_, g_pad)
    num_row_tiles = np_ // tile_m
    vmem_est = _vmem_bytes_estimate(np_, tile_m, g_pad)
    vmem_limit = int(min(max(2 * vmem_est, 32 * 1024 * 1024), 64 * 1024 * 1024))

    kernel = functools.partial(gcn_tiled_kernel, tile_m=tile_m)

    return pl.pallas_call(
        kernel,
        out_shape=jax.ShapeDtypeStruct((g_pad, LANE), jnp.float32),
        grid_spec=pltpu.PrefetchScalarGridSpec(
            num_scalar_prefetch=0,
            grid=(3, num_row_tiles),
            in_specs=[
                # x: resident across the whole grid (constant block index -> one DMA)
                pl.BlockSpec((np_, LANE), lambda l, r: (0, 0)),
                # A_hat: streamed one row tile per grid step (double-buffered)
                pl.BlockSpec((tile_m, np_), lambda l, r: (r, 0)),
                # per-layer weight / bias (leading dim squeezed)
                pl.BlockSpec((None, LANE, LANE), lambda l, r: (l, 0, 0)),
                pl.BlockSpec((None, 1, LANE), lambda l, r: (l, 0, 0)),
                # pooling matrix column tile matching the adjacency row tile
                pl.BlockSpec((g_pad, tile_m), lambda l, r: (0, r)),
            ],
            out_specs=pl.BlockSpec((g_pad, LANE), lambda l, r: (0, 0)),
            scratch_shapes=[
                pltpu.VMEM((np_, LANE), jnp.bfloat16),   # h1
                pltpu.VMEM((np_, LANE), jnp.bfloat16),   # h2
                pltpu.VMEM((np_, LANE), jnp.bfloat16),   # xw (current layer's h @ W)
            ],
        ),
        compiler_params=pltpu.CompilerParams(
            # Both axes carry state (layer barrier + scratch) -> "arbitrary".
            # TODO(synk): 'parallel' axis over block-diagonal graph partitions for v7x.
            dimension_semantics=("arbitrary", "arbitrary"),
            vmem_limit_bytes=vmem_limit,
        ),
    )(x_p, adj_p, w_p, b_p, pool_p)


def gcn_forward(x, edge_index, batch, params, num_graphs):
    """One-shot convenience wrapper (preprocess + pad + apply + slice)."""
    output_dim = params[2][0].shape[1]
    x_p, adj_p, pool_p = gcn_preprocess(x, edge_index, batch, num_graphs)
    w_p, b_p = pad_gcn_params(params)
    out_padded = gcn_apply_padded(x_p, adj_p, pool_p, w_p, b_p)
    return out_padded[:num_graphs, :output_dim]


# ---------------------------------------------------------------------------
# Demo
# ---------------------------------------------------------------------------
if __name__ == "__main__":
    key = jax.random.PRNGKey(0)

    num_nodes = 64
    num_node_features = 16
    hidden_dim = 32
    output_dim = 8
    num_graphs = 2
    num_edges = 128

    k_x, k_e, k_p = jax.random.split(key, 3)
    x = jax.random.normal(k_x, (num_nodes, num_node_features), jnp.float32)
    edge_index = jax.random.randint(k_e, (2, num_edges), 0, num_nodes, jnp.int32)
    # First half of nodes -> graph 0, second half -> graph 1.
    batch = jnp.concatenate(
        [jnp.zeros((num_nodes // 2,), jnp.int32),
         jnp.ones((num_nodes - num_nodes // 2,), jnp.int32)]
    )

    params = init_gcn_params(k_p, num_node_features, hidden_dim, output_dim)

    # Preprocess the graph and pad the parameters ONCE; reuse across forward calls.
    x_p, adj_p, pool_p = gcn_preprocess(x, edge_index, batch, num_graphs)
    w_p, b_p = pad_gcn_params(params)

    out_padded = gcn_apply_padded(x_p, adj_p, pool_p, w_p, b_p)
    out = out_padded[:num_graphs, :output_dim]
    out = jax.block_until_ready(out)

    assert out.shape == (num_graphs, output_dim)
    assert bool(jnp.all(jnp.isfinite(out)))
    print("KERNEL_OK")
</pallas_src>

<mosaic_0001>
module attributes {stable_mosaic.version = 11 : i64} {
  func.func @gcn_tiled_kernel(%arg0: i32, %arg1: i32, %arg2: memref<128x128xbf16, #tpu.memory_space<vmem>>, %arg3: memref<128x128xbf16, #tpu.memory_space<vmem>>, %arg4: memref<1x128x128xbf16, #tpu.memory_space<vmem>>, %arg5: memref<1x1x128xf32, #tpu.memory_space<vmem>>, %arg6: memref<8x128xf32, #tpu.memory_space<vmem>>, %arg7: memref<8x128xf32, #tpu.memory_space<vmem>>, %arg8: memref<128x128xbf16, #tpu.memory_space<vmem>>, %arg9: memref<128x128xbf16, #tpu.memory_space<vmem>>, %arg10: memref<128x128xbf16, #tpu.memory_space<vmem>>) attributes {dimension_semantics = [#tpu.dimension_semantics<arbitrary>, #tpu.dimension_semantics<arbitrary>], iteration_bounds = array<i64: 3, 1>, scalar_prefetch = 0 : i64, scratch_operands = 3 : i64, tpu.core_type = #tpu.core_type<tc>, window_params = [{pipeline_mode = #tpu.pipeline_mode<synchronous>, transform_indices = @transform_0, window_bounds = array<i64: 128, 128>}, {transform_indices = @transform_1, window_bounds = array<i64: 128, 128>}, {transform_indices = @transform_2, window_bounds = array<i64: 1, 128, 128>}, {transform_indices = @transform_3, window_bounds = array<i64: 1, 1, 128>}, {transform_indices = @transform_4, window_bounds = array<i64: 8, 128>}, {pipeline_mode = #tpu.pipeline_mode<synchronous>, transform_indices = @transform_5, window_bounds = array<i64: 8, 128>}]} {
    %c0_i32 = arith.constant 0 : i32
    %0 = arith.cmpi eq, %arg1, %c0_i32 : i32
    %1 = arith.extui %0 : i1 to i32
    %c0_i32_0 = arith.constant 0 : i32
    %2 = arith.cmpi ne, %1, %c0_i32_0 : i32
    scf.if %2 {
      %c0_i32_11 = arith.constant 0 : i32
      %21 = arith.cmpi eq, %arg0, %c0_i32_11 : i32
      %22 = arith.extui %21 : i1 to i32
      %c0_i32_12 = arith.constant 0 : i32
      %23 = arith.cmpi ne, %22, %c0_i32_12 : i32
      scf.if %23 {
        %c0_17 = arith.constant 0 : index
        %c0_18 = arith.constant 0 : index
        %30 = vector.load %arg2[%c0_17, %c0_18] : memref<128x128xbf16, #tpu.memory_space<vmem>>, vector<128x128xbf16>
        %c0_19 = arith.constant 0 : index
        %c0_20 = arith.constant 0 : index
        %c0_21 = arith.constant 0 : index
        %31 = vector.load %arg4[%c0_19, %c0_20, %c0_21] : memref<1x128x128xbf16, #tpu.memory_space<vmem>>, vector<1x128x128xbf16>
        %32 = vector.shape_cast %31 : vector<1x128x128xbf16> to vector<128x128xbf16>
        %cst_22 = arith.constant dense<0.000000e+00> : vector<128x128xf32>
        %33 = tpu.matmul %30, %32, %cst_22 {dimension_numbers = #tpu.dot_dimension_numbers<[1], [0], [0], [1], [0, 0, 1, 1], [], []>} : vector<128x128xbf16>, vector<128x128xbf16>, vector<128x128xf32> -> vector<128x128xf32>
        %34 = arith.truncf %33 : vector<128x128xf32> to vector<128x128xbf16>
        %c0_23 = arith.constant 0 : index
        %c0_24 = arith.constant 0 : index
        %35 = vector.load %arg10[%c0_23, %c0_24] : memref<128x128xbf16, #tpu.memory_space<vmem>>, vector<128x128xbf16>
        tpu.vector_store %arg10[%c0_23, %c0_24], %34 {strides = array<i32>} : memref<128x128xbf16, #tpu.memory_space<vmem>>, vector<128x128xbf16>,
      } else {
      }
      %c1_i32_13 = arith.constant 1 : i32
      %24 = arith.cmpi eq, %arg0, %c1_i32_13 : i32
      %25 = arith.extui %24 : i1 to i32
      %c0_i32_14 = arith.constant 0 : i32
      %26 = arith.cmpi ne, %25, %c0_i32_14 : i32
      scf.if %26 {
        %c0_17 = arith.constant 0 : index
        %c0_18 = arith.constant 0 : index
        %30 = vector.load %arg8[%c0_17, %c0_18] : memref<128x128xbf16, #tpu.memory_space<vmem>>, vector<128x128xbf16>
        %c0_19 = arith.constant 0 : index
        %c0_20 = arith.constant 0 : index
        %c0_21 = arith.constant 0 : index
        %31 = vector.load %arg4[%c0_19, %c0_20, %c0_21] : memref<1x128x128xbf16, #tpu.memory_space<vmem>>, vector<1x128x128xbf16>
        %32 = vector.shape_cast %31 : vector<1x128x128xbf16> to vector<128x128xbf16>
        %cst_22 = arith.constant dense<0.000000e+00> : vector<128x128xf32>
        %33 = tpu.matmul %30, %32, %cst_22 {dimension_numbers = #tpu.dot_dimension_numbers<[1], [0], [0], [1], [0, 0, 1, 1], [], []>} : vector<128x128xbf16>, vector<128x128xbf16>, vector<128x128xf32> -> vector<128x128xf32>
        %34 = arith.truncf %33 : vector<128x128xf32> to vector<128x128xbf16>
        %c0_23 = arith.constant 0 : index
        %c0_24 = arith.constant 0 : index
        %35 = vector.load %arg10[%c0_23, %c0_24] : memref<128x128xbf16, #tpu.memory_space<vmem>>, vector<128x128xbf16>
        tpu.vector_store %arg10[%c0_23, %c0_24], %34 {strides = array<i32>} : memref<128x128xbf16, #tpu.memory_space<vmem>>, vector<128x128xbf16>,
      } else {
      }
      %c2_i32_15 = arith.constant 2 : i32
      %27 = arith.cmpi eq, %arg0, %c2_i32_15 : i32
      %28 = arith.extui %27 : i1 to i32
      %c0_i32_16 = arith.constant 0 : i32
      %29 = arith.cmpi ne, %28, %c0_i32_16 : i32
      scf.if %29 {
        %c0_17 = arith.constant 0 : index
        %c0_18 = arith.constant 0 : index
        %30 = vector.load %arg9[%c0_17, %c0_18] : memref<128x128xbf16, #tpu.memory_space<vmem>>, vector<128x128xbf16>
        %c0_19 = arith.constant 0 : index
        %c0_20 = arith.constant 0 : index
        %c0_21 = arith.constant 0 : index
        %31 = vector.load %arg4[%c0_19, %c0_20, %c0_21] : memref<1x128x128xbf16, #tpu.memory_space<vmem>>, vector<1x128x128xbf16>
        %32 = vector.shape_cast %31 : vector<1x128x128xbf16> to vector<128x128xbf16>
        %cst_22 = arith.constant dense<0.000000e+00> : vector<128x128xf32>
        %33 = tpu.matmul %30, %32, %cst_22 {dimension_numbers = #tpu.dot_dimension_numbers<[1], [0], [0], [1], [0, 0, 1, 1], [], []>} : vector<128x128xbf16>, vector<128x128xbf16>, vector<128x128xf32> -> vector<128x128xf32>
        %34 = arith.truncf %33 : vector<128x128xf32> to vector<128x128xbf16>
        %c0_23 = arith.constant 0 : index
        %c0_24 = arith.constant 0 : index
        %35 = vector.load %arg10[%c0_23, %c0_24] : memref<128x128xbf16, #tpu.memory_space<vmem>>, vector<128x128xbf16>
        tpu.vector_store %arg10[%c0_23, %c0_24], %34 {strides = array<i32>} : memref<128x128xbf16, #tpu.memory_space<vmem>>, vector<128x128xbf16>,
      } else {
      }
    } else {
    }
    %c0 = arith.constant 0 : index
    %c0_1 = arith.constant 0 : index
    %3 = vector.load %arg3[%c0, %c0_1] : memref<128x128xbf16, #tpu.memory_space<vmem>>, vector<128x128xbf16>
    %c0_2 = arith.constant 0 : index
    %c0_3 = arith.constant 0 : index
    %4 = vector.load %arg10[%c0_2, %c0_3] : memref<128x128xbf16, #tpu.memory_space<vmem>>, vector<128x128xbf16>
    %cst = arith.constant dense<0.000000e+00> : vector<128x128xf32>
    %5 = tpu.matmul %3, %4, %cst {dimension_numbers = #tpu.dot_dimension_numbers<[1], [0], [0], [1], [0, 0, 1, 1], [], []>} : vector<128x128xbf16>, vector<128x128xbf16>, vector<128x128xf32> -> vector<128x128xf32>
    %c0_4 = arith.constant 0 : index
    %c0_5 = arith.constant 0 : index
    %c0_6 = arith.constant 0 : index
    %6 = vector.load %arg5[%c0_4, %c0_5, %c0_6] : memref<1x1x128xf32, #tpu.memory_space<vmem>>, vector<1x1x128xf32>
    %7 = vector.shape_cast %6 : vector<1x1x128xf32> to vector<1x128xf32>
    %8 = vector.broadcast %7 : vector<1x128xf32> to vector<128x128xf32>
    %9 = arith.addf %5, %8 : vector<128x128xf32>
    %c128_i32 = arith.constant 128 : i32
    %10 = arith.muli %arg1, %c128_i32 : i32
    %11 = tpu.assume_multiple %10, 128 : i32
    %c0_i32_7 = arith.constant 0 : i32
    %12 = arith.cmpi eq, %arg0, %c0_i32_7 : i32
    %13 = arith.extui %12 : i1 to i32
    %c0_i32_8 = arith.constant 0 : i32
    %14 = arith.cmpi ne, %13, %c0_i32_8 : i32
    scf.if %14 {
      %cst_11 = arith.constant 0.000000e+00 : f32
      %21 = vector.broadcast %cst_11 : f32 to vector<128x128xf32>
      %22 = arith.maximumf %9, %21 : vector<128x128xf32>
      %23 = arith.truncf %22 : vector<128x128xf32> to vector<128x128xbf16>
      %24 = arith.index_cast %11 : i32 to index
      %c0_12 = arith.constant 0 : index
      %25 = vector.load %arg8[%24, %c0_12] : memref<128x128xbf16, #tpu.memory_space<vmem>>, vector<128x128xbf16>
      tpu.vector_store %arg8[%24, %c0_12], %23 {strides = array<i32>} : memref<128x128xbf16, #tpu.memory_space<vmem>>, vector<128x128xbf16>,
    } else {
    }
    %c1_i32 = arith.constant 1 : i32
    %15 = arith.cmpi eq, %arg0, %c1_i32 : i32
    %16 = arith.extui %15 : i1 to i32
    %c0_i32_9 = arith.constant 0 : i32
    %17 = arith.cmpi ne, %16, %c0_i32_9 : i32
    scf.if %17 {
      %cst_11 = arith.constant 0.000000e+00 : f32
      %21 = vector.broadcast %cst_11 : f32 to vector<128x128xf32>
      %22 = arith.maximumf %9, %21 : vector<128x128xf32>
      %23 = arith.truncf %22 : vector<128x128xf32> to vector<128x128xbf16>
      %24 = arith.index_cast %11 : i32 to index
      %c0_12 = arith.constant 0 : index
      %25 = vector.load %arg9[%24, %c0_12] : memref<128x128xbf16, #tpu.memory_space<vmem>>, vector<128x128xbf16>
      tpu.vector_store %arg9[%24, %c0_12], %23 {strides = array<i32>} : memref<128x128xbf16, #tpu.memory_space<vmem>>, vector<128x128xbf16>,
    } else {
    }
    %c2_i32 = arith.constant 2 : i32
    %18 = arith.cmpi eq, %arg0, %c2_i32 : i32
    %19 = arith.extui %18 : i1 to i32
    %c0_i32_10 = arith.constant 0 : i32
    %20 = arith.cmpi ne, %19, %c0_i32_10 : i32
    scf.if %20 {
      %c0_i32_11 = arith.constant 0 : i32
      %21 = arith.cmpi eq, %arg1, %c0_i32_11 : i32
      %22 = arith.extui %21 : i1 to i32
      %c0_i32_12 = arith.constant 0 : i32
      %23 = arith.cmpi ne, %22, %c0_i32_12 : i32
      scf.if %23 {
        %cst_20 = arith.constant 0.000000e+00 : f32
        %31 = vector.broadcast %cst_20 : f32 to vector<8x128xf32>
        %c0_21 = arith.constant 0 : index
        %c0_22 = arith.constant 0 : index
        %32 = vector.load %arg7[%c0_21, %c0_22] : memref<8x128xf32, #tpu.memory_space<vmem>>, vector<8x128xf32>
        tpu.vector_store %arg7[%c0_21, %c0_22], %31 {strides = array<i32>} : memref<8x128xf32, #tpu.memory_space<vmem>>, vector<8x128xf32>,
      } else {
      }
      %c0_13 = arith.constant 0 : index
      %c0_14 = arith.constant 0 : index
      %24 = vector.load %arg7[%c0_13, %c0_14] : memref<8x128xf32, #tpu.memory_space<vmem>>, vector<8x128xf32>
      %c0_15 = arith.constant 0 : index
      %c0_16 = arith.constant 0 : index
      %25 = vector.load %arg6[%c0_15, %c0_16] : memref<8x128xf32, #tpu.memory_space<vmem>>, vector<8x128xf32>
      %26 = arith.truncf %25 : vector<8x128xf32> to vector<8x128xbf16>
      %27 = arith.truncf %9 : vector<128x128xf32> to vector<128x128xbf16>
      %cst_17 = arith.constant dense<0.000000e+00> : vector<8x128xf32>
      %28 = tpu.matmul %26, %27, %cst_17 {dimension_numbers = #tpu.dot_dimension_numbers<[1], [0], [0], [1], [0, 0, 1, 1], [], []>} : vector<8x128xbf16>, vector<128x128xbf16>, vector<8x128xf32> -> vector<8x128xf32>
      %29 = arith.addf %24, %28 : vector<8x128xf32>
      %c0_18 = arith.constant 0 : index
      %c0_19 = arith.constant 0 : index
      %30 = vector.load %arg7[%c0_18, %c0_19] : memref<8x128xf32, #tpu.memory_space<vmem>>, vector<8x128xf32>
      tpu.vector_store %arg7[%c0_18, %c0_19], %29 {strides = array<i32>} : memref<8x128xf32, #tpu.memory_space<vmem>>, vector<8x128xf32>,
    } else {
    }
    return
  }
  func.func @transform_0(%arg0: i32, %arg1: i32) -> (i32, i32) {
    %c0_i32 = arith.constant 0 : i32
    %c0_i32_0 = arith.constant 0 : i32
    %c0_i32_1 = arith.constant 0 : i32
    return %c0_i32, %c0_i32_0 : i32, i32
  }
  func.func @transform_1(%arg0: i32, %arg1: i32) -> (i32, i32) {
    %c0_i32 = arith.constant 0 : i32
    %c0_i32_0 = arith.constant 0 : i32
    return %arg1, %c0_i32 : i32, i32
  }
  func.func @transform_2(%arg0: i32, %arg1: i32) -> (i32, i32, i32) {
    %c0_i32 = arith.constant 0 : i32
    %c0_i32_0 = arith.constant 0 : i32
    %c0_i32_1 = arith.constant 0 : i32
    return %arg0, %c0_i32, %c0_i32_0 : i32, i32, i32
  }
  func.func @transform_3(%arg0: i32, %arg1: i32) -> (i32, i32, i32) {
    %c0_i32 = arith.constant 0 : i32
    %c0_i32_0 = arith.constant 0 : i32
    %c0_i32_1 = arith.constant 0 : i32
    return %arg0, %c0_i32, %c0_i32_0 : i32, i32, i32
  }
  func.func @transform_4(%arg0: i32, %arg1: i32) -> (i32, i32) {
    %c0_i32 = arith.constant 0 : i32
    %c0_i32_0 = arith.constant 0 : i32
    return %c0_i32, %arg1 : i32, i32
  }
  func.func @transform_5(%arg0: i32, %arg1: i32) -> (i32, i32) {
    %c0_i32 = arith.constant 0 : i32
    %c0_i32_0 = arith.constant 0 : i32
    %c0_i32_1 = arith.constant 0 : i32
    return %c0_i32, %c0_i32_0 : i32, i32
  }
}

</mosaic_0001>

<bundles_post_ra>
// kernel: gcn_apply_padded.1
= control target key start
LH: loop header
LB: loop body
LE: loop exit
PB: predicated region body
PF: predicated region fallthrough
CT: control target
= control target key end

     0   :  { %s2476_s0 = inlined_call_operand.hbm [shape: bf16[128,128], index: 0, kind: input, shape index: {}]   ;;  %s2477_s1 = inlined_call_operand.hbm [shape: bf16[128,128], index: 1, kind: input, shape index: {}]   ;;  %s2478_s2 = inlined_call_operand.hbm [shape: bf16[3,128,128], index: 2, kind: input, shape index: {}]   ;;  %s2479_s3 = inlined_call_operand.vmem [shape: f32[3,1,128], index: 3, kind: input, shape index: {}]   ;;  %s2480_s4 = inlined_call_operand.hbm [shape: f32[8,128], index: 4, kind: input, shape index: {}]   ;;  %s2481_s5 = inlined_call_operand.hbm [shape: f32[8,128], index: 5, kind: output, shape index: {}]  }
   0x1   :  { %2487 = sst [smem:[#allocation18_spill]] %s2479_s3 }
   0x2   :  { %2488 = sst [smem:[#allocation19_spill]] %s2481_s5 }
   0x3   :  { %10 = vsyncpa [#allocation6], 0 }
   0x4   :  { %11 = vsyncpa [#allocation9], 0 }
   0x5   :  { %12 = vsyncpa [#allocation7], 0  ;;  %s2104_s18 = smov 0   ;;  %s2106_s19 = smov 0  }
   0x6   :  { %s2108_s20 = smov 0   ;;  %s2110_s21 = smov 0  }
   0x7   :  { %s2112_s22 = smov 0   ;;  %s2114_s23 = smov 0  }
   0x8 LB: > { %s2133_s24 = sadd.s32 4294967295, %s2063_s23   ;;  %p91_p0 = scmp.ne.s32.totalorder %s2051_s20, %s2047_s19  ;;  %s2063_s23 = sphi %s2114_s23, %s18_s23   ;;  %s2059_s22 = sphi %s2112_s22, %s2510_s22   ;;  %s2055_s21 = sphi %s2110_s21, %s2509_s21   ;;  %s2051_s20 = sphi %s2108_s20, %s2508_s20   ;;  %s2047_s19 = sphi %s2106_s19, %s2507_s19   ;;  %s2043_s18 = sphi %s2104_s18, %s2506_s18  }
   0x9   : > { %p92_p1 = scmp.eq.s32.totalorder %s2063_s23, 0  ;;  %p97_p2 = scmp.ne.s32.totalorder %s2047_s19, %s2043_s18 }
   0xa   : > { %p2482_p3 = scmp.eq.s32.totalorder %s2133_s24, 0  ;;  %p1370_p4 = scmp.ge.s32.totalorder %s2063_s23, 1 }
   0xb   : > { %p93_p5 = por %p92_p1, %p91_p0  ;;  %p181_p6 = scmp.lt.s32.totalorder %s2063_s23, 4 }
   0xc   : > { %p2144_p7 = por %p2482_p3, %p97_p2  ;;  %s2065_s27 = smov [#allocation5]  }
   0xd   : > { %p2148_p8 = pnand %p1370_p4, %p181_p6  ;;  %s193_s28 = sshll.u32 %s2065_s27, 4  ;;  %s194_s28 = int_to_ptr.vmem [resolvable:$true] %s193_s28 }
   0xe   : > { %s2489_s25 = scalar_select %p2144_p7, 1, 0 }
   0xf   : > { %s2490_s26 = scalar_select %p2148_p8, 1, 0 }
  0x10   : > { %p1738_p9 = pneg %p2148_p8  ;;  %p1755_p11 = scmp.lt.s32.totalorder %s2063_s23, 3 }
  0x11   : > { %s1857_s8 = scalar_lea.hbm %s2476_s0, 1024 }
  0x12   : > { %p2156_p10 = pnand %p1738_p9, %p2482_p3  ;;  %p2161_p12 = pnand %p1755_p11, %p93_p5 }
  0x13   : > { %p1858_p13 = scmp.ne.s32.totalorder %s2476_s0, %s1857_s8  ;;  %p1864_p4 = scmp.lt.u32.totalorder %s1857_s8, %s2476_s0 }
  0x14   : > { %s2492_s30 = scalar_select %p2161_p12, 1, 0 }
  0x15   : > { %p2173_p0 = pneg %p2156_p10 }
  0x17   : > { %p1860_p1 = pnand %p2173_p0, %p1858_p13 }
  0x19   : > { %p1861_p2 = pneg %p1860_p1 }
  0x1b   : > { %p1866_p5 = pnand %p1864_p4, %p1861_p2 }
  0x1d   : > { %1869 = shalt.err (!%p1866_p5)
}
  0x1e   : > { %s1870_s14 = scalar_lea.vmem %s194_s28, 1024  ;;  %p1878_p3 = scmp.lt.s32.totalorder %s194_s28, %s194_s28 }
  0x1f   : > { %p1871_p6 = scmp.ne.s32.totalorder %s194_s28, %s1870_s14  ;;  %p1879_p7 = scmp.lt.s32.totalorder %s1870_s14, %s1870_s14 }
  0x21   : > { %p1873_p9 = pnand %p1871_p6, %p2173_p0  ;;  %p1880_p8 = por %p1879_p7, %p1878_p3 }
  0x23   : > { %p1874_p11 = pneg %p1873_p9 }
  0x25   : > { %p1881_p12 = pnand %p1880_p8, %p1874_p11 }
  0x27   : > { %1884 = shalt.err (!%p1881_p12)
}
  0x28   : > { %s2066_s15 = smov 64   ;;  %s2067_s16 = smov 4  }
  0x29   : > { %1741 = dma.hbm_to_vmem [thread:$0]  (!%p2156_p10), %s2476_s0, 1024, %s194_s28, [#allocation6], %s2066_s15, %s2066_s15, %s2067_s16  }
  0x2a   : > { %s2068_s27 = smov [#allocation8]   ;;  %s2069_s7 = smov [#allocation11]  }
  0x2b   : > { %s209_s6 = sshll.u32 %s2068_s27, 4  ;;  %s225_s8 = sshll.u32 %s2069_s7, 4  ;;  %s210_s6 = int_to_ptr.vmem [resolvable:$true] %s209_s6  ;;  %s226_s8 = int_to_ptr.vmem [resolvable:$true] %s225_s8 }
  0x2c   : > { %s1885_s12 = scalar_lea.hbm %s2477_s1, 1024 }
  0x2d   : > { %p1886_p3 = scmp.ne.s32.totalorder %s2477_s1, %s1885_s12  ;;  %p1892_p12 = scmp.lt.u32.totalorder %s1885_s12, %s2477_s1 }
  0x2f   : > { %p1888_p7 = pnand %p1886_p3, %p2173_p0 }
  0x31   : > { %p1889_p8 = pneg %p1888_p7 }
  0x33   : > { %p1894_p13 = pnand %p1892_p12, %p1889_p8 }
  0x35   : > { %1897 = shalt.err (!%p1894_p13)
}
  0x36   : > { %s1898_s28 = scalar_lea.vmem %s210_s6, 1024  ;;  %p1906_p5 = scmp.lt.s32.totalorder %s210_s6, %s210_s6 }
  0x37   : > { %p1899_p1 = scmp.ne.s32.totalorder %s210_s6, %s1898_s28  ;;  %p1907_p6 = scmp.lt.s32.totalorder %s1898_s28, %s1898_s28 }
  0x39   : > { %p1901_p2 = pnand %p1899_p1, %p2173_p0  ;;  %p1908_p9 = por %p1907_p6, %p1906_p5 }
  0x3b   : > { %p1902_p4 = pneg %p1901_p2 }
  0x3d   : > { %p1909_p11 = pnand %p1908_p9, %p1902_p4 }
  0x3f   : > { %1912 = shalt.err (!%p1909_p11)
}
  0x40   : > { %1744 = dma.hbm_to_vmem [thread:$0]  (!%p2156_p10), %s2477_s1, 1024, %s210_s6, [#allocation9], %s2066_s15, %s2066_s15, %s2067_s16  }
  0x41   : > { %s1913_s27 = scalar_lea.hbm %s2480_s4, 128 }
  0x42   : > { %p1914_p3 = scmp.ne.s32.totalorder %s2480_s4, %s1913_s27  ;;  %p1920_p12 = scmp.lt.u32.totalorder %s1913_s27, %s2480_s4 }
  0x44   : > { %p1916_p7 = pnand %p1914_p3, %p2173_p0 }
  0x46   : > { %p1917_p8 = pneg %p1916_p7 }
  0x48   : > { %p1922_p13 = pnand %p1920_p12, %p1917_p8 }
  0x4a   : > { %1925 = shalt.err (!%p1922_p13)
}
  0x4b   : > { %s1926_s13 = scalar_lea.vmem %s226_s8, 128  ;;  %p1934_p5 = scmp.lt.s32.totalorder %s226_s8, %s226_s8 }
  0x4c   : > { %p1927_p1 = scmp.ne.s32.totalorder %s226_s8, %s1926_s13  ;;  %p1935_p6 = scmp.lt.s32.totalorder %s1926_s13, %s1926_s13 }
  0x4e   : > { %p1929_p2 = pnand %p1927_p1, %p2173_p0  ;;  %p1936_p9 = por %p1935_p6, %p1934_p5 }
  0x50   : > { %p1930_p4 = pneg %p1929_p2 }
  0x52   : > { %p1937_p11 = pnand %p1936_p9, %p1930_p4 }
  0x54   : > { %1940 = shalt.err (!%p1937_p11)
}
  0x55   : > { %1747 = dma.hbm_to_vmem [thread:$0]  (!%p2156_p10), %s2480_s4, 128, %s226_s8, [#allocation9]  }
  0x56   : > { %s84_s11 = sadd.s32 1, %s2051_s20  ;;  %s30_s28 = sadd.s32 1, %s2059_s22 }
  0x57   : > { %s236_s3 = sand.u32 1, %s2063_s23   ;;  %p32_p0 = scmp.ge.s32.totalorder %s30_s28, 3 }
  0x58   : > { %s238_s5 = sand.u32 1, %s2051_s20   ;;  %s1434_s17 = sshll.u32 %s2059_s22, 10 }
  0x59   : > { %s2512_s28 = smov (%p32_p0, %s30_s28), 0  ;;  %s1375_s29 = sshll.u32 %s238_s5, 6 }
  0x5a   : > { %s2241_s7 = scalar_lea.hbm %s2478_s2, %s1434_s17  ;;  %s81_s8 = ssub.s32 %s2059_s22, %s2512_s28 }
  0x5b   : > { %p82_p10 = scmp.eq.s32.totalorder %s81_s8, 0  ;;  %s240_s9 = scalar_lea.vmem [#allocation10], %s1375_s29 }
  0x5c   : > { %s247_s10 = sshll.u32 %s240_s9, 4  ;;  %s2250_s13 = scalar_lea.sflag [#allocation6], %s236_s3  ;;  %s2245_s10 = int_to_ptr.vmem [resolvable:$true] %s247_s10 }
  0x5d   : > { %s2248_s12 = scalar_select %p82_p10, %s2051_s20, %s84_s11  }
  0x5e   : > { %s1941_s6 = scalar_lea.hbm %s2241_s7, 1024  ;;  %p2494_p7 = scmp.ne.s32.totalorder %s2492_s30, 0 }
  0x5f   : > { %p1942_p3 = scmp.ne.s32.totalorder %s2241_s7, %s1941_s6  ;;  %s1946_s17 = scalar_lea.hbm %s2478_s2, 3072 }
  0x60   : > { %p1943_p8 = pneg %p2494_p7  ;;  %p1947_p1 = scmp.lt.u32.totalorder %s2241_s7, %s2478_s2 }
  0x61   : > { %p1948_p2 = scmp.lt.u32.totalorder %s1946_s17, %s1941_s6  ;;  %p1950_p5 = scmp.lt.u32.totalorder %s1941_s6, %s2241_s7 }
  0x62   : > { %p1944_p12 = pnand %p1943_p8, %p1942_p3 }
  0x63   : > { %p1949_p4 = por %p1948_p2, %p1947_p1 }
  0x64   : > { %p1945_p13 = pneg %p1944_p12 }
  0x65   : > { %p1951_p6 = por %p1950_p5, %p1949_p4 }
  0x67   : > { %p1952_p9 = pnand %p1951_p6, %p1945_p13 }
  0x69   : > { %1955 = shalt.err (!%p1952_p9)
}
  0x6a   : > { %s1956_s11 = scalar_lea.vmem %s2245_s10, 1024  ;;  %s2070_s3 = smov [#allocation10]  }
  0x6b   : > { %p1957_p11 = scmp.ne.s32.totalorder %s2245_s10, %s1956_s11  ;;  %s1961_s27 = sshll.u32 %s2070_s3, 4  ;;  %s1962_s27 = int_to_ptr.vmem [resolvable:$false] %s1961_s27 }
  0x6c   : > { %s1963_s8 = scalar_lea.vmem %s1962_s27, 2048  ;;  %p1964_p3 = scmp.lt.s32.totalorder %s2245_s10, %s1962_s27 }
  0x6d   : > { %p1959_p0 = pnand %p1957_p11, %p1943_p8  ;;  %p1965_p12 = scmp.lt.s32.totalorder %s1963_s8, %s1956_s11 }
  0x6f   : > { %p1960_p10 = pneg %p1959_p0  ;;  %p1966_p1 = por %p1965_p12, %p1964_p3 }
  0x71   : > { %p1967_p2 = pnand %p1966_p1, %p1960_p10 }
  0x73   : > { %1970 = shalt.err (!%p1967_p2)
}
  0x74   : > { %1751 = dma.hbm_to_vmem [thread:$0]  (!%p2494_p7), %s2241_s7, 1024, %s2245_s10, %s2250_s13, %s2066_s15, %s2066_s15, %s2067_s16  }
  0x75   : > { %p2495_p8 = scmp.ne.s32.totalorder %s2490_s26, 0 }
  0x76   : > { %p2496_p13 = scmp.eq.s32.totalorder (!%p2495_p8), %s2133_s24, 0 }
  0x77   : > { %265 = sbr.rel (%p2495_p8) target bundleno = 1473 (0x5c1), region = 40 }
  0x7e   : > { %2022 = dma.done.wait (%p2496_p13), [#allocation6], 1024   ;;  %p2497_p4 = pmov %p2496_p13 }
  0x80   : > { %2024 = vsyncadd (%p2497_p4), [#allocation6], 4294966272  ;;  %p2498_p5 = pmov %p2497_p4 }
  0x81   : > { %p2499_p6 = pmov %p2497_p4 }
  0x82   : > { %2026 = dma.done.wait (%p2498_p5), [#allocation9], 1024  }
  0x83   : > { %2028 = vsyncadd (%p2499_p6), [#allocation9], 4294966272  ;;  %s275_s30 = sand.u32 1, %s2133_s24   ;;  %s277_s15 = sand.u32 1, %s2047_s19  }
  0x84   : > { %s1381_s16 = sshll.u32 %s277_s15, 6  ;;  %s276_s26 = scalar_lea.sflag [#allocation6], %s275_s30 }
  0x85   : > { %s2293_s7 = scalar_lea.vmem [#allocation10], %s1381_s16  ;;  %p2500_p7 = scmp.ne.s32.totalorder %s2489_s25, 0 }
  0x87   : > { %2030 = dma.done.wait (%p2500_p7), %s276_s26, 1024  }
  0x88   : > { %2032 = vsyncadd (%p2500_p7), %s276_s26, 4294966272  ;;  %p2501_p9 = pmov %p2497_p4 }
  0x89   : > { %p2502_p11 = pmov %p2497_p4 }
  0x8a   : > { %2034 = dma.done.wait (%p2501_p9), [#allocation9], 128  }
  0x8b   : > { %2036 = vsyncadd (%p2502_p11), [#allocation9], 4294967168  ;;  %p309_p0 = scmp.lt.s32.totalorder %s2055_s21, 2  ;;  %s2503_s6 = sld [smem:[#allocation18_spill]] }
  0x8c   : > { %p1383_p10 = scmp.ne.s32.totalorder %s2055_s21, 0 }
  0x8d   : > { %s2305_s9 = scalar_select %p309_p0, %s2055_s21, 2 }
  0x8e   : > { %320 = sbr.rel (%p1383_p10) target bundleno = 401 (0x191), region = 64  ;;  %v1817_v0 = vld [vmem:[%s2293_s7] sm:$0xff] (!%p1383_p10)   ;;  %v1818_v1 = vld [vmem:[%s2293_s7 + $0x8] sm:$0xff] (!%p1383_p10)   ;;  %v1819_v2 = vld [vmem:[%s2293_s7 + $0x10] sm:$0xff] (!%p1383_p10)  }
  0x8f   : > { %1508 = vmatprep.subr.bf16.mxu0 (!%p1383_p10), %v1817_v0  ;;  %1656 = vmatprep.subr.bf16.mxu1 (!%p1383_p10), %v1817_v0  ;;  %v1820_v3 = vld [vmem:[%s2293_s7 + $0x18] sm:$0xff] (!%p1383_p10)   ;;  %v1825_v4 = vld [vmem:[#allocation5] sm:$0xff] (!%p1383_p10)   ;;  %v1822_v7 = vld [vmem:[%s2293_s7 + $0x28] sm:$0xff] (!%p1383_p10)  }
  0x90   : > { %1509 = vmatpush3.bf16.msra.mxu0 (!%p1383_p10), %v1817_v0  ;;  %1664 = vmatpush3.bf16.msra.mxu1 (!%p1383_p10), %v1817_v0  ;;  %v1826_v5 = vld [vmem:[#allocation5 + $0x20] sm:$0xff] (!%p1383_p10)   ;;  %v1823_v8 = vld [vmem:[%s2293_s7 + $0x30] sm:$0xff] (!%p1383_p10)   ;;  %v1824_v9 = vld [vmem:[%s2293_s7 + $0x38] sm:$0xff] (!%p1383_p10)  }
  0x91   : > { %s311_s14 = scalar_lea.vmem %s2503_s6, %s2305_s9  ;;  %1510 = vmatprep.subr.bf16.mxu0 (!%p1383_p10), %v1818_v1  ;;  %1657 = vmatprep.subr.bf16.mxu1 (!%p1383_p10), %v1818_v1  ;;  %v1821_v6 = vld [vmem:[%s2293_s7 + $0x20] sm:$0xff] (!%p1383_p10)   ;;  %v1827_v10 = vld [vmem:[#allocation5 + $0x8] sm:$0xff] (!%p1383_p10)   ;;  %v1829_v12 = vld [vmem:[#allocation5 + $0x10] sm:$0xff] (!%p1383_p10)  }
  0x92   : > { %1524 = vmatprep.mubr.bf16.mxu0 (!%p1383_p10), %v1825_v4  ;;  %1532 = vmatprep.mubr.bf16.mxu1 (!%p1383_p10), %v1826_v5  ;;  %v1828_v11 = vld [vmem:[#allocation5 + $0x28] sm:$0xff] (!%p1383_p10)   ;;  %v1830_v13 = vld [vmem:[#allocation5 + $0x30] sm:$0xff] (!%p1383_p10)   ;;  %v1831_v14 = vld [vmem:[#allocation5 + $0x18] sm:$0xff] (!%p1383_p10)  }
  0x93   : > { %v1832_v15 = vld [vmem:[#allocation5 + $0x38] sm:$0xff] (!%p1383_p10)  }
  0x94   : > { %1511 = vmatpush3.bf16.msra.mxu0 (!%p1383_p10), %v1818_v1  ;;  %1665 = vmatpush3.bf16.msra.mxu1 (!%p1383_p10), %v1818_v1 }
  0x95   : > { %1512 = vmatprep.subr.bf16.mxu0 %v1819_v2  ;;  %1658 = vmatprep.subr.bf16.mxu1 %v1819_v2 }
  0x98   : > { %1513 = vmatpush3.bf16.msra.mxu0 %v1819_v2  ;;  %1666 = vmatpush3.bf16.msra.mxu1 %v1819_v2 }
  0x99   : > { %1514 = vmatprep.subr.bf16.mxu0 %v1820_v3  ;;  %1659 = vmatprep.subr.bf16.mxu1 %v1820_v3 }
  0x9c   : > { %1515 = vmatpush3.bf16.msra.mxu0 %v1820_v3  ;;  %1667 = vmatpush3.bf16.msra.mxu1 %v1820_v3 }
  0x9d   : > { %1516 = vmatprep.subr.bf16.mxu0 %v1821_v6  ;;  %1660 = vmatprep.subr.bf16.mxu1 %v1821_v6 }
  0xa0   : > { %1517 = vmatpush3.bf16.msra.mxu0 %v1821_v6  ;;  %1668 = vmatpush3.bf16.msra.mxu1 %v1821_v6 }
  0xa1   : > { %1518 = vmatprep.subr.bf16.mxu0 %v1822_v7  ;;  %1661 = vmatprep.subr.bf16.mxu1 %v1822_v7 }
  0xa4   : > { %1519 = vmatpush3.bf16.msra.mxu0 %v1822_v7  ;;  %1669 = vmatpush3.bf16.msra.mxu1 %v1822_v7 }
  0xa5   : > { %1520 = vmatprep.subr.bf16.mxu0 %v1823_v8  ;;  %1662 = vmatprep.subr.bf16.mxu1 %v1823_v8 }
  0xa8   : > { %1521 = vmatpush3.bf16.msra.mxu0 %v1823_v8  ;;  %1670 = vmatpush3.bf16.msra.mxu1 %v1823_v8 }
  0xa9   : > { %1522 = vmatprep.subr.bf16.mxu0 %v1824_v9  ;;  %1663 = vmatprep.subr.bf16.mxu1 %v1824_v9 }
  0xac   : > { %1523 = vmatpush3.bf16.msra.mxu0 %v1824_v9  ;;  %1671 = vmatpush3.bf16.msra.mxu1 %v1824_v9 }
  0xaf   : > { %1525 = vmatmul.mubr.bf16.vlgmr.msra.gmra.mrb[0].mxu0 %v1827_v10  ;;  %1533 = vmatmul.mubr.bf16.vlgmr.msra.gmra.mrb[0].mxu1 %v1828_v11 }
  0xb0   : > { %1528 = vmatprep.mubr.bf16.mxu0 %v1829_v12  ;;  %1536 = vmatprep.mubr.bf16.mxu1 %v1830_v13 }
  0xb7   : > { %1529 = vmatmul.mubr.bf16.gmra.mrb[4].mxu0 %v1831_v14  ;;  %1537 = vmatmul.mubr.bf16.gmra.mrb[4].mxu1 %v1832_v15 }
 0x182   : > { %v1526_v16 = vpop.f32.mrb[0].mxu0  ;;  %v1534_v17 = vpop.f32.mrb[0].mxu1 }
 0x183   : > { %v483_v18 = vpop.f32.mrb[1].mxu0  ;;  %v515_v19 = vpop.f32.mrb[1].mxu1 }
 0x184   : > { %v1527_v20 = vpop.f32.mrb[2].mxu0  ;;  %v1535_v21 = vpop.f32.mrb[2].mxu1 }
 0x185   : > { %v547_v22 = vpack.c.bf16 %v1527_v20, %v1526_v16  ;;  %v551_v23 = vpack.c.bf16 %v1535_v21, %v1534_v17  ;;  %v486_v24 = vpop.f32.mrb[3].mxu0  ;;  %v518_v25 = vpop.f32.mrb[3].mxu1 }
 0x186   : > { %v546_v26 = vpack.c.bf16 %v486_v24, %v483_v18  ;;  %v550_v27 = vpack.c.bf16 %v518_v25, %v515_v19 }
 0x187   : > { %555 = vst [vmem:[#allocation4 + $0x8] sm:$0xff] %v547_v22  ;;  %559 = vst [vmem:[#allocation4 + $0x28] sm:$0xff] %v551_v23 }
 0x188   : > { %554 = vst [vmem:[#allocation4] sm:$0xff] %v546_v26  ;;  %558 = vst [vmem:[#allocation4 + $0x20] sm:$0xff] %v550_v27 }
 0x18a   : > { %v1530_v28 = vpop.f32.mrb[4].mxu0  ;;  %v1538_v29 = vpop.f32.mrb[4].mxu1 }
 0x18b   : > { %v499_v30 = vpop.f32.mrb[5].mxu0  ;;  %v531_v31 = vpop.f32.mrb[5].mxu1 }
 0x18c   : > { %v1531_v32 = vpop.f32.mrb[6].mxu0  ;;  %v1539_v33 = vpop.f32.mrb[6].mxu1 }
 0x18d   : > { %v549_v34 = vpack.c.bf16 %v1531_v32, %v1530_v28  ;;  %v553_v35 = vpack.c.bf16 %v1539_v33, %v1538_v29  ;;  %v502_v36 = vpop.f32.mrb[7].mxu0  ;;  %v534_v37 = vpop.f32.mrb[7].mxu1 }
 0x18e   : > { %v548_v38 = vpack.c.bf16 %v502_v36, %v499_v30  ;;  %v552_v39 = vpack.c.bf16 %v534_v37, %v531_v31 }
 0x18f   : > { %557 = vst [vmem:[#allocation4 + $0x18] sm:$0xff] %v549_v34  ;;  %561 = vst [vmem:[#allocation4 + $0x38] sm:$0xff] %v553_v35 }
 0x190   : > { %556 = vst [vmem:[#allocation4 + $0x10] sm:$0xff] %v548_v38  ;;  %560 = vst [vmem:[#allocation4 + $0x30] sm:$0xff] %v552_v39 }
 0x191 PF: > { %p1400_p3 = scmp.ne.s32.totalorder %s2055_s21, 1 }
 0x192   : > { %v1833_v40 = vld [vmem:[%s2293_s7] sm:$0xff] (!%p1400_p3)   ;;  %v1834_v41 = vld [vmem:[%s2293_s7 + $0x8] sm:$0xff] (!%p1400_p3)   ;;  %v1835_v42 = vld [vmem:[%s2293_s7 + $0x10] sm:$0xff] (!%p1400_p3)  }
 0x193   : > { %565 = sbr.rel (%p1400_p3) target bundleno = 661 (0x295), region = 68  ;;  %1540 = vmatprep.subr.bf16.mxu0 (!%p1400_p3), %v1833_v40  ;;  %1672 = vmatprep.subr.bf16.mxu1 (!%p1400_p3), %v1833_v40  ;;  %v1836_v43 = vld [vmem:[%s2293_s7 + $0x18] sm:$0xff] (!%p1400_p3)   ;;  %v566_v44 = vld [vmem:[#allocation2] sm:$0xff] (!%p1400_p3)  ;;  %v1838_v47 = vld [vmem:[%s2293_s7 + $0x28] sm:$0xff] (!%p1400_p3)  }
 0x194   : > { %1541 = vmatpush3.bf16.msra.mxu0 (!%p1400_p3), %v1833_v40  ;;  %1680 = vmatpush3.bf16.msra.mxu1 (!%p1400_p3), %v1833_v40  ;;  %v570_v45 = vld [vmem:[#allocation2 + $0x20] sm:$0xff] (!%p1400_p3)  ;;  %v1839_v48 = vld [vmem:[%s2293_s7 + $0x30] sm:$0xff] (!%p1400_p3)   ;;  %v1840_v49 = vld [vmem:[%s2293_s7 + $0x38] sm:$0xff] (!%p1400_p3)  }
 0x195   : > { %1542 = vmatprep.subr.bf16.mxu0 (!%p1400_p3), %v1834_v41  ;;  %1673 = vmatprep.subr.bf16.mxu1 (!%p1400_p3), %v1834_v41  ;;  %v1837_v46 = vld [vmem:[%s2293_s7 + $0x20] sm:$0xff] (!%p1400_p3)   ;;  %v567_v50 = vld [vmem:[#allocation2 + $0x8] sm:$0xff] (!%p1400_p3)  ;;  %v568_v52 = vld [vmem:[#allocation2 + $0x10] sm:$0xff] (!%p1400_p3) }
 0x196   : > { %1556 = vmatprep.mubr.bf16.mxu0 (!%p1400_p3), %v566_v44  ;;  %1564 = vmatprep.mubr.bf16.mxu1 (!%p1400_p3), %v570_v45  ;;  %v571_v51 = vld [vmem:[#allocation2 + $0x28] sm:$0xff] (!%p1400_p3)  ;;  %v572_v53 = vld [vmem:[#allocation2 + $0x30] sm:$0xff] (!%p1400_p3)  ;;  %v569_v54 = vld [vmem:[#allocation2 + $0x18] sm:$0xff] (!%p1400_p3) }
 0x197   : > { %v573_v55 = vld [vmem:[#allocation2 + $0x38] sm:$0xff] (!%p1400_p3) }
 0x198   : > { %1543 = vmatpush3.bf16.msra.mxu0 (!%p1400_p3), %v1834_v41  ;;  %1681 = vmatpush3.bf16.msra.mxu1 (!%p1400_p3), %v1834_v41 }
 0x199   : > { %1544 = vmatprep.subr.bf16.mxu0 (!%p1400_p3), %v1835_v42  ;;  %1674 = vmatprep.subr.bf16.mxu1 (!%p1400_p3), %v1835_v42 }
 0x19c   : > { %1545 = vmatpush3.bf16.msra.mxu0 %v1835_v42  ;;  %1682 = vmatpush3.bf16.msra.mxu1 %v1835_v42 }
 0x19d   : > { %1546 = vmatprep.subr.bf16.mxu0 %v1836_v43  ;;  %1675 = vmatprep.subr.bf16.mxu1 %v1836_v43 }
 0x1a0   : > { %1547 = vmatpush3.bf16.msra.mxu0 %v1836_v43  ;;  %1683 = vmatpush3.bf16.msra.mxu1 %v1836_v43 }
 0x1a1   : > { %1548 = vmatprep.subr.bf16.mxu0 %v1837_v46  ;;  %1676 = vmatprep.subr.bf16.mxu1 %v1837_v46 }
 0x1a4   : > { %1549 = vmatpush3.bf16.msra.mxu0 %v1837_v46  ;;  %1684 = vmatpush3.bf16.msra.mxu1 %v1837_v46 }
 0x1a5   : > { %1550 = vmatprep.subr.bf16.mxu0 %v1838_v47  ;;  %1677 = vmatprep.subr.bf16.mxu1 %v1838_v47 }
 0x1a8   : > { %1551 = vmatpush3.bf16.msra.mxu0 %v1838_v47  ;;  %1685 = vmatpush3.bf16.msra.mxu1 %v1838_v47 }
 0x1a9   : > { %1552 = vmatprep.subr.bf16.mxu0 %v1839_v48  ;;  %1678 = vmatprep.subr.bf16.mxu1 %v1839_v48 }
 0x1ac   : > { %1553 = vmatpush3.bf16.msra.mxu0 %v1839_v48  ;;  %1686 = vmatpush3.bf16.msra.mxu1 %v1839_v48 }
 0x1ad   : > { %1554 = vmatprep.subr.bf16.mxu0 %v1840_v49  ;;  %1679 = vmatprep.subr.bf16.mxu1 %v1840_v49 }
 0x1b0   : > { %1555 = vmatpush3.bf16.msra.mxu0 %v1840_v49  ;;  %1687 = vmatpush3.bf16.msra.mxu1 %v1840_v49 }
 0x1b3   : > { %1557 = vmatmul.mubr.bf16.vlgmr.msra.gmra.mrb[0].mxu0 %v567_v50  ;;  %1565 = vmatmul.mubr.bf16.vlgmr.msra.gmra.mrb[0].mxu1 %v571_v51 }
 0x1b4   : > { %1560 = vmatprep.mubr.bf16.mxu0 %v568_v52  ;;  %1568 = vmatprep.mubr.bf16.mxu1 %v572_v53 }
 0x1bb   : > { %1561 = vmatmul.mubr.bf16.gmra.mrb[4].mxu0 %v569_v54  ;;  %1569 = vmatmul.mubr.bf16.gmra.mrb[4].mxu1 %v573_v55 }
 0x286   : > { %v1558_v56 = vpop.f32.mrb[0].mxu0  ;;  %v1566_v57 = vpop.f32.mrb[0].mxu1 }
 0x287   : > { %v672_v58 = vpop.f32.mrb[1].mxu0  ;;  %v704_v59 = vpop.f32.mrb[1].mxu1 }
 0x288   : > { %v1559_v60 = vpop.f32.mrb[2].mxu0  ;;  %v1567_v61 = vpop.f32.mrb[2].mxu1 }
 0x289   : > { %v736_v62 = vpack.c.bf16 %v1559_v60, %v1558_v56  ;;  %v740_v63 = vpack.c.bf16 %v1567_v61, %v1566_v57  ;;  %v675_v0 = vpop.f32.mrb[3].mxu0  ;;  %v707_v1 = vpop.f32.mrb[3].mxu1 }
 0x28a   : > { %v735_v2 = vpack.c.bf16 %v675_v0, %v672_v58  ;;  %v739_v3 = vpack.c.bf16 %v707_v1, %v704_v59 }
 0x28b   : > { %744 = vst [vmem:[#allocation4 + $0x8] sm:$0xff] %v736_v62  ;;  %748 = vst [vmem:[#allocation4 + $0x28] sm:$0xff] %v740_v63 }
 0x28c   : > { %743 = vst [vmem:[#allocation4] sm:$0xff] %v735_v2  ;;  %747 = vst [vmem:[#allocation4 + $0x20] sm:$0xff] %v739_v3 }
 0x28e   : > { %v1562_v4 = vpop.f32.mrb[4].mxu0  ;;  %v1570_v5 = vpop.f32.mrb[4].mxu1 }
 0x28f   : > { %v688_v6 = vpop.f32.mrb[5].mxu0  ;;  %v720_v7 = vpop.f32.mrb[5].mxu1 }
 0x290   : > { %v1563_v8 = vpop.f32.mrb[6].mxu0  ;;  %v1571_v9 = vpop.f32.mrb[6].mxu1 }
 0x291   : > { %v738_v10 = vpack.c.bf16 %v1563_v8, %v1562_v4  ;;  %v742_v11 = vpack.c.bf16 %v1571_v9, %v1570_v5  ;;  %v691_v12 = vpop.f32.mrb[7].mxu0  ;;  %v723_v13 = vpop.f32.mrb[7].mxu1 }
 0x292   : > { %v737_v14 = vpack.c.bf16 %v691_v12, %v688_v6  ;;  %v741_v15 = vpack.c.bf16 %v723_v13, %v720_v7 }
 0x293   : > { %746 = vst [vmem:[#allocation4 + $0x18] sm:$0xff] %v738_v10  ;;  %750 = vst [vmem:[#allocation4 + $0x38] sm:$0xff] %v742_v11 }
 0x294   : > { %745 = vst [vmem:[#allocation4 + $0x10] sm:$0xff] %v737_v14  ;;  %749 = vst [vmem:[#allocation4 + $0x30] sm:$0xff] %v741_v15 }
 0x295 PF: > { %p1409_p12 = scmp.ne.s32.totalorder %s2055_s21, 2 }
 0x296   : > { %v1841_v16 = vld [vmem:[%s2293_s7] sm:$0xff] (!%p1409_p12)   ;;  %v1842_v17 = vld [vmem:[%s2293_s7 + $0x8] sm:$0xff] (!%p1409_p12)   ;;  %v1843_v18 = vld [vmem:[%s2293_s7 + $0x10] sm:$0xff] (!%p1409_p12)  }
 0x297   : > { %754 = sbr.rel (%p1409_p12) target bundleno = 921 (0x399), region = 72  ;;  %1572 = vmatprep.subr.bf16.mxu0 (!%p1409_p12), %v1841_v16  ;;  %1688 = vmatprep.subr.bf16.mxu1 (!%p1409_p12), %v1841_v16  ;;  %v1844_v19 = vld [vmem:[%s2293_s7 + $0x18] sm:$0xff] (!%p1409_p12)   ;;  %v755_v20 = vld [vmem:[#allocation3] sm:$0xff] (!%p1409_p12)  ;;  %v1846_v23 = vld [vmem:[%s2293_s7 + $0x28] sm:$0xff] (!%p1409_p12)  }
 0x298   : > { %1573 = vmatpush3.bf16.msra.mxu0 (!%p1409_p12), %v1841_v16  ;;  %1696 = vmatpush3.bf16.msra.mxu1 (!%p1409_p12), %v1841_v16  ;;  %v759_v21 = vld [vmem:[#allocation3 + $0x20] sm:$0xff] (!%p1409_p12)  ;;  %v1847_v24 = vld [vmem:[%s2293_s7 + $0x30] sm:$0xff] (!%p1409_p12)   ;;  %v1848_v25 = vld [vmem:[%s2293_s7 + $0x38] sm:$0xff] (!%p1409_p12)  }
 0x299   : > { %1574 = vmatprep.subr.bf16.mxu0 (!%p1409_p12), %v1842_v17  ;;  %1689 = vmatprep.subr.bf16.mxu1 (!%p1409_p12), %v1842_v17  ;;  %v1845_v22 = vld [vmem:[%s2293_s7 + $0x20] sm:$0xff] (!%p1409_p12)   ;;  %v756_v26 = vld [vmem:[#allocation3 + $0x8] sm:$0xff] (!%p1409_p12)  ;;  %v757_v28 = vld [vmem:[#allocation3 + $0x10] sm:$0xff] (!%p1409_p12) }
 0x29a   : > { %1588 = vmatprep.mubr.bf16.mxu0 (!%p1409_p12), %v755_v20  ;;  %1596 = vmatprep.mubr.bf16.mxu1 (!%p1409_p12), %v759_v21  ;;  %v760_v27 = vld [vmem:[#allocation3 + $0x28] sm:$0xff] (!%p1409_p12)  ;;  %v761_v29 = vld [vmem:[#allocation3 + $0x30] sm:$0xff] (!%p1409_p12)  ;;  %v758_v30 = vld [vmem:[#allocation3 + $0x18] sm:$0xff] (!%p1409_p12) }
 0x29b   : > { %v762_v31 = vld [vmem:[#allocation3 + $0x38] sm:$0xff] (!%p1409_p12) }
 0x29c   : > { %1575 = vmatpush3.bf16.msra.mxu0 (!%p1409_p12), %v1842_v17  ;;  %1697 = vmatpush3.bf16.msra.mxu1 (!%p1409_p12), %v1842_v17 }
 0x29d   : > { %1576 = vmatprep.subr.bf16.mxu0 (!%p1409_p12), %v1843_v18  ;;  %1690 = vmatprep.subr.bf16.mxu1 (!%p1409_p12), %v1843_v18 }
 0x2a0   : > { %1577 = vmatpush3.bf16.msra.mxu0 %v1843_v18  ;;  %1698 = vmatpush3.bf16.msra.mxu1 %v1843_v18 }
 0x2a1   : > { %1578 = vmatprep.subr.bf16.mxu0 %v1844_v19  ;;  %1691 = vmatprep.subr.bf16.mxu1 %v1844_v19 }
 0x2a4   : > { %1579 = vmatpush3.bf16.msra.mxu0 %v1844_v19  ;;  %1699 = vmatpush3.bf16.msra.mxu1 %v1844_v19 }
 0x2a5   : > { %1580 = vmatprep.subr.bf16.mxu0 %v1845_v22  ;;  %1692 = vmatprep.subr.bf16.mxu1 %v1845_v22 }
 0x2a8   : > { %1581 = vmatpush3.bf16.msra.mxu0 %v1845_v22  ;;  %1700 = vmatpush3.bf16.msra.mxu1 %v1845_v22 }
 0x2a9   : > { %1582 = vmatprep.subr.bf16.mxu0 %v1846_v23  ;;  %1693 = vmatprep.subr.bf16.mxu1 %v1846_v23 }
 0x2ac   : > { %1583 = vmatpush3.bf16.msra.mxu0 %v1846_v23  ;;  %1701 = vmatpush3.bf16.msra.mxu1 %v1846_v23 }
 0x2ad   : > { %1584 = vmatprep.subr.bf16.mxu0 %v1847_v24  ;;  %1694 = vmatprep.subr.bf16.mxu1 %v1847_v24 }
 0x2b0   : > { %1585 = vmatpush3.bf16.msra.mxu0 %v1847_v24  ;;  %1702 = vmatpush3.bf16.msra.mxu1 %v1847_v24 }
 0x2b1   : > { %1586 = vmatprep.subr.bf16.mxu0 %v1848_v25  ;;  %1695 = vmatprep.subr.bf16.mxu1 %v1848_v25 }
 0x2b4   : > { %1587 = vmatpush3.bf16.msra.mxu0 %v1848_v25  ;;  %1703 = vmatpush3.bf16.msra.mxu1 %v1848_v25 }
 0x2b7   : > { %1589 = vmatmul.mubr.bf16.vlgmr.msra.gmra.mrb[0].mxu0 %v756_v26  ;;  %1597 = vmatmul.mubr.bf16.vlgmr.msra.gmra.mrb[0].mxu1 %v760_v27 }
 0x2b8   : > { %1592 = vmatprep.mubr.bf16.mxu0 %v757_v28  ;;  %1600 = vmatprep.mubr.bf16.mxu1 %v761_v29 }
 0x2bf   : > { %1593 = vmatmul.mubr.bf16.gmra.mrb[4].mxu0 %v758_v30  ;;  %1601 = vmatmul.mubr.bf16.gmra.mrb[4].mxu1 %v762_v31 }
 0x38a   : > { %v1590_v32 = vpop.f32.mrb[0].mxu0  ;;  %v1598_v33 = vpop.f32.mrb[0].mxu1 }
 0x38b   : > { %v861_v34 = vpop.f32.mrb[1].mxu0  ;;  %v893_v35 = vpop.f32.mrb[1].mxu1 }
 0x38c   : > { %v1591_v36 = vpop.f32.mrb[2].mxu0  ;;  %v1599_v37 = vpop.f32.mrb[2].mxu1 }
 0x38d   : > { %v925_v38 = vpack.c.bf16 %v1591_v36, %v1590_v32  ;;  %v929_v39 = vpack.c.bf16 %v1599_v37, %v1598_v33  ;;  %v864_v40 = vpop.f32.mrb[3].mxu0  ;;  %v896_v41 = vpop.f32.mrb[3].mxu1 }
 0x38e   : > { %v924_v42 = vpack.c.bf16 %v864_v40, %v861_v34  ;;  %v928_v43 = vpack.c.bf16 %v896_v41, %v893_v35 }
 0x38f   : > { %933 = vst [vmem:[#allocation4 + $0x8] sm:$0xff] %v925_v38  ;;  %937 = vst [vmem:[#allocation4 + $0x28] sm:$0xff] %v929_v39 }
 0x390   : > { %932 = vst [vmem:[#allocation4] sm:$0xff] %v924_v42  ;;  %936 = vst [vmem:[#allocation4 + $0x20] sm:$0xff] %v928_v43 }
 0x392   : > { %v1594_v44 = vpop.f32.mrb[4].mxu0  ;;  %v1602_v45 = vpop.f32.mrb[4].mxu1 }
 0x393   : > { %v877_v46 = vpop.f32.mrb[5].mxu0  ;;  %v909_v47 = vpop.f32.mrb[5].mxu1 }
 0x394   : > { %v1595_v48 = vpop.f32.mrb[6].mxu0  ;;  %v1603_v49 = vpop.f32.mrb[6].mxu1 }
 0x395   : > { %v927_v50 = vpack.c.bf16 %v1595_v48, %v1594_v44  ;;  %v931_v51 = vpack.c.bf16 %v1603_v49, %v1602_v45  ;;  %v880_v52 = vpop.f32.mrb[7].mxu0  ;;  %v912_v53 = vpop.f32.mrb[7].mxu1 }
 0x396   : > { %v926_v54 = vpack.c.bf16 %v880_v52, %v877_v46  ;;  %v930_v55 = vpack.c.bf16 %v912_v53, %v909_v47 }
 0x397   : > { %935 = vst [vmem:[#allocation4 + $0x18] sm:$0xff] %v927_v50  ;;  %939 = vst [vmem:[#allocation4 + $0x38] sm:$0xff] %v931_v51 }
 0x398   : > { %934 = vst [vmem:[#allocation4 + $0x10] sm:$0xff] %v926_v54  ;;  %938 = vst [vmem:[#allocation4 + $0x30] sm:$0xff] %v930_v55 }
 0x399 PF: > { %v956_v56 = vld [vmem:[#allocation4] sm:$0xff]  ;;  %v957_v57 = vld [vmem:[#allocation4 + $0x8] sm:$0xff]  ;;  %v1853_v4 = vld [vmem:[#allocation8 + $0x10] sm:$0xff]  }
 0x39a   : > { %1604 = vmatprep.subr.bf16.mxu0 %v956_v56  ;;  %1704 = vmatprep.subr.bf16.mxu1 %v956_v56  ;;  %v1849_v59 = vld [vmem:[#allocation8] sm:$0xff]   ;;  %v961_v63 = vld [vmem:[#allocation4 + $0x28] sm:$0xff]  ;;  %v1854_v5 = vld [vmem:[#allocation8 + $0x30] sm:$0xff]  }
 0x39b   : > { %1605 = vmatpush3.bf16.msra.mxu0 %v956_v56  ;;  %1712 = vmatpush3.bf16.msra.mxu1 %v956_v56  ;;  %v1850_v60 = vld [vmem:[#allocation8 + $0x20] sm:$0xff]   ;;  %v1851_v2 = vld [vmem:[#allocation8 + $0x8] sm:$0xff]   ;;  %v1855_v6 = vld [vmem:[#allocation8 + $0x18] sm:$0xff]  }
 0x39c   : > { %1606 = vmatprep.subr.bf16.mxu0 %v957_v57  ;;  %1705 = vmatprep.subr.bf16.mxu1 %v957_v57  ;;  %v960_v62 = vld [vmem:[#allocation4 + $0x20] sm:$0xff]  ;;  %v1852_v3 = vld [vmem:[#allocation8 + $0x28] sm:$0xff]   ;;  %v1856_v7 = vld [vmem:[#allocation8 + $0x38] sm:$0xff]  }
 0x39d   : > { %1620 = vmatprep.mubr.bf16.mxu0 %v1849_v59  ;;  %1628 = vmatprep.mubr.bf16.mxu1 %v1850_v60  ;;  %v1418_v8 = vld [vmem:[%s311_s14] ss:$0 sm:$0xff] }
 0x39e   : > { %v959_v61 = vld [vmem:[#allocation4 + $0x18] sm:$0xff] }
 0x39f   : > { %v958_v58 = vld [vmem:[#allocation4 + $0x10] sm:$0xff]  ;;  %1607 = vmatpush3.bf16.msra.mxu0 %v957_v57  ;;  %1713 = vmatpush3.bf16.msra.mxu1 %v957_v57  ;;  %v963_v1 = vld [vmem:[#allocation4 + $0x38] sm:$0xff] }
 0x3a0   : > { %1608 = vmatprep.subr.bf16.mxu0 %v958_v58  ;;  %1706 = vmatprep.subr.bf16.mxu1 %v958_v58  ;;  %v962_v0 = vld [vmem:[#allocation4 + $0x30] sm:$0xff] }
 0x3a3   : > { %1609 = vmatpush3.bf16.msra.mxu0 %v958_v58  ;;  %1714 = vmatpush3.bf16.msra.mxu1 %v958_v58 }
 0x3a4   : > { %1610 = vmatprep.subr.bf16.mxu0 %v959_v61  ;;  %1707 = vmatprep.subr.bf16.mxu1 %v959_v61 }
 0x3a7   : > { %1611 = vmatpush3.bf16.msra.mxu0 %v959_v61  ;;  %1715 = vmatpush3.bf16.msra.mxu1 %v959_v61 }
 0x3a8   : > { %1612 = vmatprep.subr.bf16.mxu0 %v960_v62  ;;  %1708 = vmatprep.subr.bf16.mxu1 %v960_v62 }
 0x3ab   : > { %1613 = vmatpush3.bf16.msra.mxu0 %v960_v62  ;;  %1716 = vmatpush3.bf16.msra.mxu1 %v960_v62 }
 0x3ac   : > { %1614 = vmatprep.subr.bf16.mxu0 %v961_v63  ;;  %1709 = vmatprep.subr.bf16.mxu1 %v961_v63 }
 0x3af   : > { %1615 = vmatpush3.bf16.msra.mxu0 %v961_v63  ;;  %1717 = vmatpush3.bf16.msra.mxu1 %v961_v63 }
 0x3b0   : > { %1616 = vmatprep.subr.bf16.mxu0 %v962_v0  ;;  %1710 = vmatprep.subr.bf16.mxu1 %v962_v0 }
 0x3b3   : > { %1617 = vmatpush3.bf16.msra.mxu0 %v962_v0  ;;  %1718 = vmatpush3.bf16.msra.mxu1 %v962_v0 }
 0x3b4   : > { %1618 = vmatprep.subr.bf16.mxu0 %v963_v1  ;;  %1711 = vmatprep.subr.bf16.mxu1 %v963_v1 }
 0x3b7   : > { %1619 = vmatpush3.bf16.msra.mxu0 %v963_v1  ;;  %1719 = vmatpush3.bf16.msra.mxu1 %v963_v1 }
 0x3ba   : > { %1621 = vmatmul.mubr.bf16.vlgmr.msra.gmra.mrb[0].mxu0 %v1851_v2  ;;  %1629 = vmatmul.mubr.bf16.vlgmr.msra.gmra.mrb[0].mxu1 %v1852_v3 }
 0x3bb   : > { %1624 = vmatprep.mubr.bf16.mxu0 %v1853_v4  ;;  %1632 = vmatprep.mubr.bf16.mxu1 %v1854_v5 }
 0x3c2   : > { %1625 = vmatmul.mubr.bf16.gmra.mrb[4].mxu0 %v1855_v6  ;;  %1633 = vmatmul.mubr.bf16.gmra.mrb[4].mxu1 %v1856_v7 }
 0x48d   : > { %v1622_v9 = vpop.f32.mrb[0].mxu0  ;;  %v1630_v10 = vpop.f32.mrb[0].mxu1 }
 0x48e   : > { %v2349_v11 = vadd.f32 %v1622_v9, %v1418_v8  ;;  %v2351_v12 = vadd.f32 %v1630_v10, %v1418_v8  ;;  %v1053_v13 = vpop.f32.mrb[1].mxu0  ;;  %v1085_v14 = vpop.f32.mrb[1].mxu1 }
 0x48f   : > { %v2353_v15 = vadd.f32 %v1418_v8, %v1053_v13  ;;  %v2355_v16 = vadd.f32 %v1418_v8, %v1085_v14  ;;  %v1623_v17 = vpop.f32.mrb[2].mxu0  ;;  %v1631_v18 = vpop.f32.mrb[2].mxu1 }
 0x490   : > { %v2357_v19 = vadd.f32 %v1623_v17, %v1418_v8  ;;  %v2359_v20 = vadd.f32 %v1631_v18, %v1418_v8  ;;  %v1056_v21 = vpop.f32.mrb[3].mxu0  ;;  %v1088_v22 = vpop.f32.mrb[3].mxu1  ;;  %v1123_v43 = vmax.f32 (!%p1383_p10), %v2349_v11, 0.0  ;;  %v1131_v55 = vmax.f32 (!%p1383_p10), %v2351_v12, 0.0 }
 0x491   : > { %v2361_v23 = vadd.f32 %v1418_v8, %v1056_v21  ;;  %v2363_v24 = vadd.f32 %v1418_v8, %v1088_v22  ;;  %v1121_v41 = vmax.f32 (!%p1383_p10), %v2353_v15, 0.0  ;;  %v1129_v51 = vmax.f32 (!%p1383_p10), %v2355_v16, 0.0 }
 0x492   : > { %v1124_v44 = vmax.f32 (!%p1383_p10), %v2357_v19, 0.0  ;;  %v1132_v56 = vmax.f32 (!%p1383_p10), %v2359_v20, 0.0 }
 0x493   : > { %1120 = sbr.rel (%p1383_p10) target bundleno = 1184 (0x4a0), region = 76  ;;  %v1122_v42 = vmax.f32 (!%p1383_p10), %v2361_v23, 0.0  ;;  %v1130_v52 = vmax.f32 (!%p1383_p10), %v2363_v24, 0.0 }
 0x494   : > { %v1138_v50 = vpack.c.bf16 (!%p1383_p10), %v1124_v44, %v1123_v43  ;;  %v1142_v61 = vpack.c.bf16 (!%p1383_p10), %v1132_v56, %v1131_v55 }
 0x495   : > { %v1626_v25 = vpop.f32.mrb[4].mxu0  ;;  %v1634_v26 = vpop.f32.mrb[4].mxu1  ;;  %v1137_v49 = vpack.c.bf16 (!%p1383_p10), %v1122_v42, %v1121_v41  ;;  %v1141_v57 = vpack.c.bf16 (!%p1383_p10), %v1130_v52, %v1129_v51 }
 0x496   : > { %v2365_v27 = vadd.f32 %v1626_v25, %v1418_v8  ;;  %v2367_v28 = vadd.f32 %v1634_v26, %v1418_v8  ;;  %v1069_v29 = vpop.f32.mrb[5].mxu0  ;;  %v1101_v30 = vpop.f32.mrb[5].mxu1  ;;  %1150 = vst [vmem:[#allocation2 + $0x8] sm:$0xff] (!%p1383_p10), %v1138_v50  ;;  %1154 = vst [vmem:[#allocation2 + $0x28] sm:$0xff] (!%p1383_p10), %v1142_v61 }
 0x497   : > { %v2369_v31 = vadd.f32 %v1418_v8, %v1069_v29  ;;  %v2371_v32 = vadd.f32 %v1418_v8, %v1101_v30  ;;  %v1627_v33 = vpop.f32.mrb[6].mxu0  ;;  %v1635_v34 = vpop.f32.mrb[6].mxu1  ;;  %1149 = vst [vmem:[#allocation2] sm:$0xff] (!%p1383_p10), %v1137_v49  ;;  %1153 = vst [vmem:[#allocation2 + $0x20] sm:$0xff] (!%p1383_p10), %v1141_v57 }
 0x498   : > { %v2373_v35 = vadd.f32 %v1627_v33, %v1418_v8  ;;  %v2375_v36 = vadd.f32 %v1635_v34, %v1418_v8  ;;  %v1072_v37 = vpop.f32.mrb[7].mxu0  ;;  %v1104_v38 = vpop.f32.mrb[7].mxu1  ;;  %v1127_v47 = vmax.f32 (!%p1383_p10), %v2365_v27, 0.0  ;;  %v1135_v60 = vmax.f32 (!%p1383_p10), %v2367_v28, 0.0 }
 0x499   : > { %v2377_v39 = vadd.f32 %v1418_v8, %v1072_v37  ;;  %v2379_v40 = vadd.f32 %v1418_v8, %v1104_v38  ;;  %v1125_v45 = vmax.f32 (!%p1383_p10), %v2369_v31, 0.0  ;;  %v1133_v58 = vmax.f32 (!%p1383_p10), %v2371_v32, 0.0 }
 0x49a   : > { %v1128_v48 = vmax.f32 %v2373_v35, 0.0  ;;  %v1136_v62 = vmax.f32 %v2375_v36, 0.0 }
 0x49b   : > { %v1126_v46 = vmax.f32 %v2377_v39, 0.0  ;;  %v1134_v59 = vmax.f32 %v2379_v40, 0.0 }
 0x49c   : > { %v1140_v54 = vpack.c.bf16 %v1128_v48, %v1127_v47  ;;  %v1144_v0 = vpack.c.bf16 %v1136_v62, %v1135_v60 }
 0x49d   : > { %v1139_v53 = vpack.c.bf16 %v1126_v46, %v1125_v45  ;;  %v1143_v63 = vpack.c.bf16 %v1134_v59, %v1133_v58 }
 0x49e   : > { %1152 = vst [vmem:[#allocation2 + $0x18] sm:$0xff] %v1140_v54  ;;  %1156 = vst [vmem:[#allocation2 + $0x38] sm:$0xff] %v1144_v0 }
 0x49f   : > { %1151 = vst [vmem:[#allocation2 + $0x10] sm:$0xff] %v1139_v53  ;;  %1155 = vst [vmem:[#allocation2 + $0x30] sm:$0xff] %v1143_v63 }
 0x4a0 PF: > { %1160 = sbr.rel (%p1400_p3) target bundleno = 1194 (0x4aa), region = 80  ;;  %v1161_v1 = vmax.f32 (!%p1400_p3), %v2353_v15, 0.0  ;;  %v1162_v2 = vmax.f32 (!%p1400_p3), %v2361_v23, 0.0  ;;  %v1163_v3 = vmax.f32 (!%p1400_p3), %v2349_v11, 0.0  ;;  %v1164_v4 = vmax.f32 (!%p1400_p3), %v2357_v19, 0.0 }
 0x4a1   : > { %v1165_v5 = vmax.f32 (!%p1400_p3), %v2369_v31, 0.0  ;;  %v1166_v6 = vmax.f32 (!%p1400_p3), %v2377_v39, 0.0  ;;  %v1167_v7 = vmax.f32 (!%p1400_p3), %v2365_v27, 0.0  ;;  %v1168_v8 = vmax.f32 (!%p1400_p3), %v2373_v35, 0.0 }
 0x4a2   : > { %v1177_v9 = vpack.c.bf16 (!%p1400_p3), %v1162_v2, %v1161_v1  ;;  %v1178_v10 = vpack.c.bf16 (!%p1400_p3), %v1164_v4, %v1163_v3  ;;  %v1169_v13 = vmax.f32 (!%p1400_p3), %v2355_v16, 0.0  ;;  %v1170_v14 = vmax.f32 (!%p1400_p3), %v2363_v24, 0.0 }
 0x4a3   : > { %v1179_v17 = vpack.c.bf16 (!%p1400_p3), %v1166_v6, %v1165_v5  ;;  %v1180_v18 = vpack.c.bf16 (!%p1400_p3), %v1168_v8, %v1167_v7  ;;  %v1171_v21 = vmax.f32 (!%p1400_p3), %v2351_v12, 0.0  ;;  %v1172_v22 = vmax.f32 (!%p1400_p3), %v2359_v20, 0.0 }
 0x4a4   : > { %1189 = vst [vmem:[#allocation3] sm:$0xff] (!%p1400_p3), %v1177_v9  ;;  %1190 = vst [vmem:[#allocation3 + $0x8] sm:$0xff] (!%p1400_p3), %v1178_v10  ;;  %v1181_v25 = vpack.c.bf16 (!%p1400_p3), %v1170_v14, %v1169_v13  ;;  %v1173_v26 = vmax.f32 (!%p1400_p3), %v2371_v32, 0.0  ;;  %v1174_v29 = vmax.f32 (!%p1400_p3), %v2379_v40, 0.0  ;;  %v1175_v30 = vmax.f32 (!%p1400_p3), %v2367_v28, 0.0 }
 0x4a5   : > { %1191 = vst [vmem:[#allocation3 + $0x10] sm:$0xff] (!%p1400_p3), %v1179_v17  ;;  %1192 = vst [vmem:[#allocation3 + $0x18] sm:$0xff] (!%p1400_p3), %v1180_v18  ;;  %v1182_v33 = vpack.c.bf16 (!%p1400_p3), %v1172_v22, %v1171_v21  ;;  %v1176_v34 = vmax.f32 (!%p1400_p3), %v2375_v36, 0.0 }
 0x4a6   : > { %1193 = vst [vmem:[#allocation3 + $0x20] sm:$0xff] (!%p1400_p3), %v1181_v25  ;;  %v1183_v37 = vpack.c.bf16 (!%p1400_p3), %v1174_v29, %v1173_v26 }
 0x4a7   : > { %1194 = vst [vmem:[#allocation3 + $0x28] sm:$0xff] %v1182_v33  ;;  %v1184_v38 = vpack.c.bf16 %v1176_v34, %v1175_v30 }
 0x4a8   : > { %1195 = vst [vmem:[#allocation3 + $0x30] sm:$0xff] %v1183_v37 }
 0x4a9   : > { %1196 = vst [vmem:[#allocation3 + $0x38] sm:$0xff] %v1184_v38 }
 0x4aa PF: > { %1200 = sbr.rel (%p1409_p12) target bundleno = 1442 (0x5a2), region = 84  ;;  %v1208_v41 = vpack.c.bf16 (!%p1409_p12), %v2361_v23, %v2353_v15  ;;  %v2071_v42 = vmov (!%p1409_p12), 0.0   ;;  %v1209_v43 = vpack.c.bf16 (!%p1409_p12), %v2357_v19, %v2349_v11  ;;  %vm2072_vm0 = vmmov (!%p1409_p12), 0  }
 0x4ab   : > { %1636 = vmatprep.subr.bf16.mxu0 (!%p1409_p12), %v2071_v42  ;;  %1652 = vmatprep.mubr.msk.bf16.mxu0 (!%p1409_p12), %vm2072_vm0, %v2071_v42  ;;  %v1210_v44 = vpack.c.bf16 (!%p1409_p12), %v2377_v39, %v2369_v31  ;;  %v1211_v45 = vpack.c.bf16 (!%p1409_p12), %v2373_v35, %v2365_v27  ;;  %v1212_v15 = vpack.c.bf16 (!%p1409_p12), %v2363_v24, %v2355_v16  ;;  %v1206_v27 = vld [vmem:[#allocation11] sm:$0xff] (!%p1409_p12) }
 0x4ac   : > { %1637 = vmatpush3.bf16.msra.mxu0 (!%p1409_p12), %v1208_v41  ;;  %v1213_v11 = vpack.c.bf16 (!%p1409_p12), %v2359_v20, %v2351_v12  ;;  %v1214_v19 = vpack.c.bf16 (!%p1409_p12), %v2379_v40, %v2371_v32  ;;  %v1215_v23 = vpack.c.bf16 (!%p1409_p12), %v2375_v36, %v2367_v28  ;;  %v1207_v31 = vpack.c.bf16 (!%p1409_p12), %v1206_v27, %v1206_v27 }
 0x4ad   : > { %1638 = vmatprep.subr.bf16.mxu0 (!%p1409_p12), %v2071_v42 }
 0x4b0   : > { %1639 = vmatpush3.bf16.msra.mxu0 (!%p1409_p12), %v1209_v43 }
 0x4b1   : > { %1640 = vmatprep.subr.bf16.mxu0 %v2071_v42 }
 0x4b4   : > { %1641 = vmatpush3.bf16.msra.mxu0 %v1210_v44 }
 0x4b5   : > { %1642 = vmatprep.subr.bf16.mxu0 %v2071_v42 }
 0x4b8   : > { %1643 = vmatpush3.bf16.msra.mxu0 %v1211_v45 }
 0x4b9   : > { %1644 = vmatprep.subr.bf16.mxu0 %v2071_v42 }
 0x4bc   : > { %1645 = vmatpush3.bf16.msra.mxu0 %v1212_v15 }
 0x4bd   : > { %1646 = vmatprep.subr.bf16.mxu0 %v2071_v42 }
 0x4c0   : > { %1647 = vmatpush3.bf16.msra.mxu0 %v1213_v11 }
 0x4c1   : > { %1648 = vmatprep.subr.bf16.mxu0 %v2071_v42 }
 0x4c4   : > { %1649 = vmatpush3.bf16.msra.mxu0 %v1214_v19 }
 0x4c5   : > { %1650 = vmatprep.subr.bf16.mxu0 %v2071_v42 }
 0x4c8   : > { %1651 = vmatpush3.bf16.msra.mxu0 %v1215_v23 }
 0x4cb   : > { %1653 = vmatmul.mubr.bf16.vlgmr.msra.gmra.mrb[0].mxu0 %v1207_v31 }
 0x59e   : > { %v1250_v16 = vpop.f32.mrb[0].mxu0 }
 0x59f   : > { %v1654_v24 = vpop.f32.mrb[1].mxu0  ;;  %1257 = vst [vmem:[#allocation12] sm:$0xff] %v1250_v16 }
 0x5a0   : > { %v1253_v35 = vpop.f32.mrb[2].mxu0 }
 0x5a1   : > { %v1655_v12 = vpop.f32.mrb[3].mxu0 }
 0x5a2 PF: > { %p1759_p1 = scmp.eq.s32.totalorder %s2133_s24, 2  ;;  %s2073_s21 = smov [#allocation12]  }
 0x5a3   : > { %s1265_s29 = sshll.u32 %s2073_s21, 4  ;;  %s1266_s29 = int_to_ptr.vmem [resolvable:$true] %s1265_s29 }
 0x5a4   : > { %s1971_s18 = scalar_lea.vmem %s1266_s29, 128  ;;  %p1978_p4 = scmp.lt.s32.totalorder %s1266_s29, %s1266_s29 }
 0x5a5   : > { %p1972_p2 = scmp.ne.s32.totalorder %s1266_s29, %s1971_s18  ;;  %p1979_p5 = scmp.lt.s32.totalorder %s1971_s18, %s1971_s18 }
 0x5a7   : > { %p1973_p8 = pnand %p1972_p2, %p1759_p1  ;;  %p1980_p6 = por %p1979_p5, %p1978_p4 }
 0x5a9   : > { %p1974_p13 = pneg %p1973_p8 }
 0x5ab   : > { %p1981_p7 = pnand %p1980_p6, %p1974_p13 }
 0x5ad   : > { %1984 = shalt.err (!%p1981_p7)
}
 0x5ae   : > { %s2505_s27 = sld [smem:[#allocation19_spill]] }
 0x5b4   : > { %s1985_s8 = scalar_lea.hbm %s2505_s27, 128 }
 0x5b5   : > { %p1986_p9 = scmp.ne.s32.totalorder %s2505_s27, %s1985_s8  ;;  %p1991_p10 = scmp.lt.u32.totalorder %s1985_s8, %s2505_s27 }
 0x5b7   : > { %p1987_p11 = pnand %p1986_p9, %p1759_p1 }
 0x5b9   : > { %p1988_p0 = pneg %p1987_p11 }
 0x5bb   : > { %p1993_p3 = pnand %p1991_p10, %p1988_p0 }
 0x5bd   : > { %1996 = shalt.err (!%p1993_p3)
}
 0x5be   : > { %1735 = dma.vmem_to_hbm [thread:$0]  (%p1759_p1), %s1266_s29, 128, %s2505_s27, [#allocation7]  }
 0x5bf   : > { %2038 = dma.done.wait (%p1759_p1), [#allocation7], 128  }
 0x5c0   : > { %2040 = vsyncadd (%p1759_p1), [#allocation7], 4294967168 }
 0x5c1 PF: > { %s18_s23 = sadd.s32 1, %s2063_s23   ;;  %s2506_s18 = smov %s2047_s19 }
 0x5c2   : > { %p15_p12 = scmp.ge.s32.totalorder %s18_s23, 5   ;;  %s2507_s19 = smov %s2051_s20 }
 0x5c3   : > { %s2508_s20 = smov %s2248_s12  ;;  %s2509_s21 = smov %s2059_s22 }
 0x5c4   : > { %s2510_s22 = smov %s2512_s28  ;;  %17 = sbr.rel (!%p15_p12) target bundleno = 8 (0x8), region = 127 }
 0x5cb   :  { %1278 = vsyncpa [#allocation6], 1 }
 0x5cc   :  { %1280 = vsyncpa [#allocation6 + $0x1], 1 }
 0x5cd   :  { %1281 = vsyncpa [#allocation9], 1 }
 0x5ce   :  { %1282 = vsyncpa [#allocation7], 1 }
 0x5cf   :  { %1284 = vsyncpa [#allocation7 + $0x1], 1 }

</bundles_post_ra>
